<compile_context>
chip_gen: v7x
topology: tpu7x:2x2x1
jax: 0.10.0
libtpu: 0.0.40
codegen_flags: <defaults>
</compile_context>

<pallas_src>
import functools

import jax
import jax.numpy as jnp
from jax.experimental import pallas as pl
from jax.experimental.pallas import tpu as pltpu


def _cross_attention_kernel(x_ref, y_ref, wq_ref, bq_ref, wk_ref, bk_ref,
                            wv_ref, bv_ref, w1_ref, b1_ref, o_ref,
                            *, heads, scale, matmul_dtype):
    """CrossAttention forward for one batch element.

    x_ref : (1, Nq, q_dim)    query source
    y_ref : (1, Nk, kv_dim)   key/value source
    wq/wk/wv : (heads, in_dim, dh)   per-head projection weights (x @ W layout)
    bq/bk/bv : (heads, 1, dh)
    w1       : (heads, dh, dim)      per-head rows of the nn1 Linear weight
    b1       : (1, dim)
    o_ref    : (1, Nq, dim)
    """
    x = x_ref[0].astype(jnp.float32)                    # (Nq, q_dim)
    y = y_ref[0].astype(jnp.float32)                    # (Nk, kv_dim)
    nq = x.shape[0]
    nk = y.shape[0]

    # Broadcast token rows across the head batch dim once (leading-dim broadcast, cheap).
    xb = jnp.broadcast_to(x[None], (heads, nq, x.shape[1])).astype(matmul_dtype)
    yb = jnp.broadcast_to(y[None], (heads, nk, y.shape[1])).astype(matmul_dtype)

    def bmm(a, w_ref):  # (h, n, in) @ (h, in, out) -> (h, n, out), f32 accumulate on MXU
        return jnp.einsum('hni,hio->hno', a, w_ref[...].astype(matmul_dtype),
                          preferred_element_type=jnp.float32)

    qh = bmm(xb, wq_ref) + bq_ref[...]                  # (h, Nq, dh)
    kh = bmm(yb, wk_ref) + bk_ref[...]                  # (h, Nk, dh)
    vh = bmm(yb, wv_ref) + bv_ref[...]                  # (h, Nk, dh)

    # Scores: contract last dims directly (no explicit transpose of k).
    dots = jnp.einsum('hid,hjd->hij', qh.astype(matmul_dtype), kh.astype(matmul_dtype),
                      preferred_element_type=jnp.float32) * scale   # (h, Nq, Nk)

    # TODO(synk): mask path not implemented (reference test path uses mask=None).
    dots = dots - jnp.max(dots, axis=-1, keepdims=True)
    e = jnp.exp(dots)
    denom = jnp.sum(e, axis=-1, keepdims=True)
    attn = e * pl.reciprocal(denom, approx=True)                    # softmax, EUP reciprocal

    out_h = jnp.einsum('hij,hjd->hid', attn.astype(matmul_dtype), vh.astype(matmul_dtype),
                       preferred_element_type=jnp.float32)          # (h, Nq, dh)

    # Fused 'h n d -> n (h d)' rearrange + nn1 Linear:
    #   out[n, :] = sum_h out_h[h, n, :] @ W1[h*dh:(h+1)*dh, :] + b1
    per_head = jnp.einsum('hnd,hdf->hnf', out_h.astype(matmul_dtype),
                          w1_ref[...].astype(matmul_dtype),
                          preferred_element_type=jnp.float32)        # (h, Nq, dim)
    out = jnp.sum(per_head, axis=0) + b1_ref[...]                    # (Nq, dim)

    # Dropout (do1) is identity in eval mode.
    o_ref[0] = out.astype(o_ref.dtype)


def _split_heads_w(w, heads):
    """(in_dim, dim) -> (heads, in_dim, dh) matching 'b n (h d) -> b h n d'."""
    in_dim, dim = w.shape
    dh = dim // heads
    return w.reshape(in_dim, heads, dh).transpose(1, 0, 2)


def _split_heads_b(b, heads):
    """(dim,) or (1, dim) -> (heads, 1, dh)."""
    b = b.reshape(-1)
    dh = b.shape[0] // heads
    return b.reshape(heads, 1, dh)


def cross_attention(x, y, params, *, heads, use_bf16_matmul=False):
    """x: (B, Nq, q_dim), y: (B, Nk, kv_dim) -> (B, Nq, dim)."""
    B, Nq, q_dim = x.shape
    By, Nk, kv_dim = y.shape
    assert B == By
    dim = params["wq"].shape[1]
    assert dim % heads == 0
    dh = dim // heads
    scale = float(kv_dim) ** -0.5                 # matches PyTorch: kv_dim ** -0.5
    matmul_dtype = jnp.bfloat16 if use_bf16_matmul else jnp.float32

    # Wrapper-side (XLA) weight re-layout so the kernel needs no lane-dim reshapes/transposes.
    wq = _split_heads_w(params["wq"], heads)      # (h, q_dim, dh)
    wk = _split_heads_w(params["wk"], heads)      # (h, kv_dim, dh)
    wv = _split_heads_w(params["wv"], heads)      # (h, kv_dim, dh)
    bq = _split_heads_b(params["bq"], heads)      # (h, 1, dh)
    bk = _split_heads_b(params["bk"], heads)
    bv = _split_heads_b(params["bv"], heads)
    w1 = params["w1"].reshape(heads, dh, dim)     # (h, dh, dim)
    b1 = params["b1"].reshape(1, dim)

    kernel = functools.partial(_cross_attention_kernel, heads=heads,
                               scale=scale, matmul_dtype=matmul_dtype)

    full = lambda shape: pl.BlockSpec(shape, lambda b: (0,) * len(shape))

    return pl.pallas_call(
        kernel,
        out_shape=jax.ShapeDtypeStruct((B, Nq, dim), x.dtype),
        grid_spec=pltpu.PrefetchScalarGridSpec(
            num_scalar_prefetch=0,
            grid=(B,),
            in_specs=[
                pl.BlockSpec((1, Nq, q_dim), lambda b: (b, 0, 0)),    # x
                pl.BlockSpec((1, Nk, kv_dim), lambda b: (b, 0, 0)),   # y
                full((heads, q_dim, dh)),                             # Wq (per-head)
                full((heads, 1, dh)),                                 # bq
                full((heads, kv_dim, dh)),                            # Wk
                full((heads, 1, dh)),                                 # bk
                full((heads, kv_dim, dh)),                            # Wv
                full((heads, 1, dh)),                                 # bv
                full((heads, dh, dim)),                               # W1 (per-head rows)
                full((1, dim)),                                       # b1
            ],
            out_specs=pl.BlockSpec((1, Nq, dim), lambda b: (b, 0, 0)),
        ),
        compiler_params=pltpu.CompilerParams(
            dimension_semantics=("parallel",)),     # shards batch across v7x's 2 TCs
    )(x, y, wq, bq, wk, bk, wv, bv, w1, b1)


def _reference(x, y, p, *, heads):
    """Pure-JAX mirror of the PyTorch CrossAttention forward (mask=None, eval)."""
    B, Nq, _ = x.shape
    _, Nk, kv_dim = y.shape
    dim = p["wq"].shape[1]
    dh = dim // heads
    scale = float(kv_dim) ** -0.5
    q = x @ p["wq"] + p["bq"].reshape(1, 1, dim)
    k = y @ p["wk"] + p["bk"].reshape(1, 1, dim)
    v = y @ p["wv"] + p["bv"].reshape(1, 1, dim)
    q = q.reshape(B, Nq, heads, dh).transpose(0, 2, 1, 3)
    k = k.reshape(B, Nk, heads, dh).transpose(0, 2, 1, 3)
    v = v.reshape(B, Nk, heads, dh).transpose(0, 2, 1, 3)
    dots = jnp.einsum('bhid,bhjd->bhij', q, k) * scale
    attn = jax.nn.softmax(dots, axis=-1)
    out = jnp.einsum('bhij,bhjd->bhid', attn, v)
    out = out.transpose(0, 2, 1, 3).reshape(B, Nq, dim)
    return out @ p["w1"] + p["b1"].reshape(1, 1, dim)


if __name__ == "__main__":
    # CrossAttention(q_dim=24, kv_dim=16, dim=32, heads=4), batch=2, seq=8.
    B, Nq, Nk = 2, 8, 8
    Q_DIM, KV_DIM, DIM, HEADS = 24, 16, 32, 4

    key = jax.random.PRNGKey(0)
    kx, ky, k0, k1, k2, k3, k4, k5 = jax.random.split(key, 8)
    x = jax.random.normal(kx, (B, Nq, Q_DIM), jnp.float32)
    y = jax.random.normal(ky, (B, Nk, KV_DIM), jnp.float32)
    params = {
        "wq": jax.random.normal(k0, (Q_DIM, DIM), jnp.float32) * 0.1,
        "bq": jax.random.normal(k1, (DIM,), jnp.float32) * 0.01,
        "wk": jax.random.normal(k2, (KV_DIM, DIM), jnp.float32) * 0.1,
        "bk": jnp.zeros((DIM,), jnp.float32),
        "wv": jax.random.normal(k3, (KV_DIM, DIM), jnp.float32) * 0.1,
        "bv": jnp.zeros((DIM,), jnp.float32),
        "w1": jax.random.normal(k4, (DIM, DIM), jnp.float32) * 0.1,
        "b1": jax.random.normal(k5, (DIM,), jnp.float32) * 0.01,
    }

    out = cross_attention(x, y, params, heads=HEADS)
    out = jax.block_until_ready(out)
    assert out.shape == (B, Nq, DIM)

    ref = jax.block_until_ready(_reference(x, y, params, heads=HEADS))
    max_err = float(jnp.max(jnp.abs(out - ref)))
    assert jnp.allclose(out, ref, atol=1e-2, rtol=1e-2), f"max_err={max_err}"

    print("KERNEL_OK")
</pallas_src>

<mosaic_0001>
module attributes {stable_mosaic.version = 11 : i64} {
  func.func @_cross_attention_kernel(%arg0: i32, %arg1: memref<1x8x24xf32, #tpu.memory_space<vmem>>, %arg2: memref<1x8x16xf32, #tpu.memory_space<vmem>>, %arg3: memref<4x24x8xf32, #tpu.memory_space<vmem>>, %arg4: memref<4x1x8xf32, #tpu.memory_space<vmem>>, %arg5: memref<4x16x8xf32, #tpu.memory_space<vmem>>, %arg6: memref<4x1x8xf32, #tpu.memory_space<vmem>>, %arg7: memref<4x16x8xf32, #tpu.memory_space<vmem>>, %arg8: memref<4x1x8xf32, #tpu.memory_space<vmem>>, %arg9: memref<4x8x32xf32, #tpu.memory_space<vmem>>, %arg10: memref<1x32xf32, #tpu.memory_space<vmem>>, %arg11: memref<1x8x32xf32, #tpu.memory_space<vmem>>) attributes {dimension_semantics = [#tpu.dimension_semantics<parallel>], iteration_bounds = array<i64: 2>, scalar_prefetch = 0 : i64, scratch_operands = 0 : i64, tpu.core_type = #tpu.core_type<tc>, window_params = [{transform_indices = @transform_0, window_bounds = array<i64: 1, 8, 24>}, {transform_indices = @transform_1, window_bounds = array<i64: 1, 8, 16>}, {pipeline_mode = #tpu.pipeline_mode<synchronous>, transform_indices = @transform_2, window_bounds = array<i64: 4, 24, 8>}, {pipeline_mode = #tpu.pipeline_mode<synchronous>, transform_indices = @transform_3, window_bounds = array<i64: 4, 1, 8>}, {pipeline_mode = #tpu.pipeline_mode<synchronous>, transform_indices = @transform_4, window_bounds = array<i64: 4, 16, 8>}, {pipeline_mode = #tpu.pipeline_mode<synchronous>, transform_indices = @transform_5, window_bounds = array<i64: 4, 1, 8>}, {pipeline_mode = #tpu.pipeline_mode<synchronous>, transform_indices = @transform_6, window_bounds = array<i64: 4, 16, 8>}, {pipeline_mode = #tpu.pipeline_mode<synchronous>, transform_indices = @transform_7, window_bounds = array<i64: 4, 1, 8>}, {pipeline_mode = #tpu.pipeline_mode<synchronous>, transform_indices = @transform_8, window_bounds = array<i64: 4, 8, 32>}, {pipeline_mode = #tpu.pipeline_mode<synchronous>, transform_indices = @transform_9, window_bounds = array<i64: 1, 32>}, {transform_indices = @transform_10, window_bounds = array<i64: 1, 8, 32>}]} {
    %c0 = arith.constant 0 : index
    %c0_0 = arith.constant 0 : index
    %c0_1 = arith.constant 0 : index
    %0 = vector.load %arg1[%c0, %c0_0, %c0_1] : memref<1x8x24xf32, #tpu.memory_space<vmem>>, vector<1x8x24xf32>
    %1 = vector.shape_cast %0 : vector<1x8x24xf32> to vector<8x24xf32>
    %c0_2 = arith.constant 0 : index
    %c0_3 = arith.constant 0 : index
    %c0_4 = arith.constant 0 : index
    %2 = vector.load %arg2[%c0_2, %c0_3, %c0_4] : memref<1x8x16xf32, #tpu.memory_space<vmem>>, vector<1x8x16xf32>
    %3 = vector.shape_cast %2 : vector<1x8x16xf32> to vector<8x16xf32>
    %4 = vector.shape_cast %1 : vector<8x24xf32> to vector<1x8x24xf32>
    %5 = vector.shape_cast %4 : vector<1x8x24xf32> to vector<1x8x24xf32>
    %6 = vector.broadcast %5 : vector<1x8x24xf32> to vector<4x8x24xf32>
    %7 = vector.shape_cast %3 : vector<8x16xf32> to vector<1x8x16xf32>
    %8 = vector.shape_cast %7 : vector<1x8x16xf32> to vector<1x8x16xf32>
    %9 = vector.broadcast %8 : vector<1x8x16xf32> to vector<4x8x16xf32>
    %c0_5 = arith.constant 0 : index
    %c0_6 = arith.constant 0 : index
    %c0_7 = arith.constant 0 : index
    %10 = vector.load %arg3[%c0_5, %c0_6, %c0_7] : memref<4x24x8xf32, #tpu.memory_space<vmem>>, vector<4x24x8xf32>
    "tpu.trace_start"() <{level = 10 : i32, message = "hni,hio->hno"}> : () -> ()
    %cst = arith.constant dense<0.000000e+00> : vector<4x8x8xf32>
    %11 = tpu.matmul %6, %10, %cst {dimension_numbers = #tpu.dot_dimension_numbers<[2], [1], [1], [2], [0, 0, 0, 1, 1, 2], [0], [0]>} : vector<4x8x24xf32>, vector<4x24x8xf32>, vector<4x8x8xf32> -> vector<4x8x8xf32>
    "tpu.trace_stop"() : () -> ()
    %c0_8 = arith.constant 0 : index
    %c0_9 = arith.constant 0 : index
    %c0_10 = arith.constant 0 : index
    %12 = vector.load %arg4[%c0_8, %c0_9, %c0_10] : memref<4x1x8xf32, #tpu.memory_space<vmem>>, vector<4x1x8xf32>
    %13 = vector.broadcast %12 : vector<4x1x8xf32> to vector<4x8x8xf32>
    %14 = arith.addf %11, %13 : vector<4x8x8xf32>
    %c0_11 = arith.constant 0 : index
    %c0_12 = arith.constant 0 : index
    %c0_13 = arith.constant 0 : index
    %15 = vector.load %arg5[%c0_11, %c0_12, %c0_13] : memref<4x16x8xf32, #tpu.memory_space<vmem>>, vector<4x16x8xf32>
    "tpu.trace_start"() <{level = 10 : i32, message = "hni,hio->hno"}> : () -> ()
    %cst_14 = arith.constant dense<0.000000e+00> : vector<4x8x8xf32>
    %16 = tpu.matmul %9, %15, %cst_14 {dimension_numbers = #tpu.dot_dimension_numbers<[2], [1], [1], [2], [0, 0, 0, 1, 1, 2], [0], [0]>} : vector<4x8x16xf32>, vector<4x16x8xf32>, vector<4x8x8xf32> -> vector<4x8x8xf32>
    "tpu.trace_stop"() : () -> ()
    %c0_15 = arith.constant 0 : index
    %c0_16 = arith.constant 0 : index
    %c0_17 = arith.constant 0 : index
    %17 = vector.load %arg6[%c0_15, %c0_16, %c0_17] : memref<4x1x8xf32, #tpu.memory_space<vmem>>, vector<4x1x8xf32>
    %18 = vector.broadcast %17 : vector<4x1x8xf32> to vector<4x8x8xf32>
    %19 = arith.addf %16, %18 : vector<4x8x8xf32>
    %c0_18 = arith.constant 0 : index
    %c0_19 = arith.constant 0 : index
    %c0_20 = arith.constant 0 : index
    %20 = vector.load %arg7[%c0_18, %c0_19, %c0_20] : memref<4x16x8xf32, #tpu.memory_space<vmem>>, vector<4x16x8xf32>
    "tpu.trace_start"() <{level = 10 : i32, message = "hni,hio->hno"}> : () -> ()
    %cst_21 = arith.constant dense<0.000000e+00> : vector<4x8x8xf32>
    %21 = tpu.matmul %9, %20, %cst_21 {dimension_numbers = #tpu.dot_dimension_numbers<[2], [1], [1], [2], [0, 0, 0, 1, 1, 2], [0], [0]>} : vector<4x8x16xf32>, vector<4x16x8xf32>, vector<4x8x8xf32> -> vector<4x8x8xf32>
    "tpu.trace_stop"() : () -> ()
    %c0_22 = arith.constant 0 : index
    %c0_23 = arith.constant 0 : index
    %c0_24 = arith.constant 0 : index
    %22 = vector.load %arg8[%c0_22, %c0_23, %c0_24] : memref<4x1x8xf32, #tpu.memory_space<vmem>>, vector<4x1x8xf32>
    %23 = vector.broadcast %22 : vector<4x1x8xf32> to vector<4x8x8xf32>
    %24 = arith.addf %21, %23 : vector<4x8x8xf32>
    "tpu.trace_start"() <{level = 10 : i32, message = "hid,hjd->hij"}> : () -> ()
    %cst_25 = arith.constant dense<0.000000e+00> : vector<4x8x8xf32>
    %25 = tpu.matmul %14, %19, %cst_25 {dimension_numbers = #tpu.dot_dimension_numbers<[2], [2], [1], [1], [0, 0, 0, 1, 1, 1], [0], [0]>} : vector<4x8x8xf32>, vector<4x8x8xf32>, vector<4x8x8xf32> -> vector<4x8x8xf32>
    "tpu.trace_stop"() : () -> ()
    %cst_26 = arith.constant 2.500000e-01 : f32
    %26 = vector.broadcast %cst_26 : f32 to vector<4x8x8xf32>
    %27 = arith.mulf %25, %26 : vector<4x8x8xf32>
    %cst_27 = arith.constant dense<0xFF800000> : vector<4x8xf32>
    %28 = vector.multi_reduction <maximumf>, %27, %cst_27 [2] : vector<4x8x8xf32> to vector<4x8xf32>
    %29 = vector.shape_cast %28 : vector<4x8xf32> to vector<4x8x1xf32>
    %30 = vector.broadcast %29 : vector<4x8x1xf32> to vector<4x8x8xf32>
    %31 = arith.subf %27, %30 : vector<4x8x8xf32>
    %32 = math.exp %31 : vector<4x8x8xf32>
    %cst_28 = arith.constant dense<0.000000e+00> : vector<4x8xf32>
    %33 = vector.multi_reduction <add>, %32, %cst_28 [2] : vector<4x8x8xf32> to vector<4x8xf32>
    %34 = vector.shape_cast %33 : vector<4x8xf32> to vector<4x8x1xf32>
    %35 = tpu.reciprocal %34 {approx = true} : vector<4x8x1xf32> -> vector<4x8x1xf32>
    %36 = vector.broadcast %35 : vector<4x8x1xf32> to vector<4x8x8xf32>
    %37 = arith.mulf %32, %36 : vector<4x8x8xf32>
    "tpu.trace_start"() <{level = 10 : i32, message = "hij,hjd->hid"}> : () -> ()
    %cst_29 = arith.constant dense<0.000000e+00> : vector<4x8x8xf32>
    %38 = tpu.matmul %37, %24, %cst_29 {dimension_numbers = #tpu.dot_dimension_numbers<[2], [1], [1], [2], [0, 0, 0, 1, 1, 2], [0], [0]>} : vector<4x8x8xf32>, vector<4x8x8xf32>, vector<4x8x8xf32> -> vector<4x8x8xf32>
    "tpu.trace_stop"() : () -> ()
    %c0_30 = arith.constant 0 : index
    %c0_31 = arith.constant 0 : index
    %c0_32 = arith.constant 0 : index
    %39 = vector.load %arg9[%c0_30, %c0_31, %c0_32] : memref<4x8x32xf32, #tpu.memory_space<vmem>>, vector<4x8x32xf32>
    "tpu.trace_start"() <{level = 10 : i32, message = "hnd,hdf->hnf"}> : () -> ()
    %cst_33 = arith.constant dense<0.000000e+00> : vector<4x8x32xf32>
    %40 = tpu.matmul %38, %39, %cst_33 {dimension_numbers = #tpu.dot_dimension_numbers<[2], [1], [1], [2], [0, 0, 0, 1, 1, 2], [0], [0]>} : vector<4x8x8xf32>, vector<4x8x32xf32>, vector<4x8x32xf32> -> vector<4x8x32xf32>
    "tpu.trace_stop"() : () -> ()
    %cst_34 = arith.constant dense<0.000000e+00> : vector<8x32xf32>
    %41 = vector.multi_reduction <add>, %40, %cst_34 [0] : vector<4x8x32xf32> to vector<8x32xf32>
    %c0_35 = arith.constant 0 : index
    %c0_36 = arith.constant 0 : index
    %42 = vector.load %arg10[%c0_35, %c0_36] : memref<1x32xf32, #tpu.memory_space<vmem>>, vector<1x32xf32>
    %43 = vector.broadcast %42 : vector<1x32xf32> to vector<8x32xf32>
    %44 = arith.addf %41, %43 : vector<8x32xf32>
    %c0_37 = arith.constant 0 : index
    %c0_38 = arith.constant 0 : index
    %c0_39 = arith.constant 0 : index
    %45 = vector.load %arg11[%c0_37, %c0_38, %c0_39] : memref<1x8x32xf32, #tpu.memory_space<vmem>>, vector<1x8x32xf32>
    %46 = vector.shape_cast %45 : vector<1x8x32xf32> to vector<8x32xf32>
    %47 = vector.shape_cast %44 : vector<8x32xf32> to vector<1x8x32xf32>
    tpu.vector_store %arg11[%c0_37, %c0_38, %c0_39], %47 {strides = array<i32>} : memref<1x8x32xf32, #tpu.memory_space<vmem>>, vector<1x8x32xf32>,
    return
  }
  func.func @transform_0(%arg0: i32) -> (i32, i32, i32) {
    %c0_i32 = arith.constant 0 : i32
    %c0_i32_0 = arith.constant 0 : i32
    %c0_i32_1 = arith.constant 0 : i32
    return %arg0, %c0_i32, %c0_i32_0 : i32, i32, i32
  }
  func.func @transform_1(%arg0: i32) -> (i32, i32, i32) {
    %c0_i32 = arith.constant 0 : i32
    %c0_i32_0 = arith.constant 0 : i32
    %c0_i32_1 = arith.constant 0 : i32
    return %arg0, %c0_i32, %c0_i32_0 : i32, i32, i32
  }
  func.func @transform_2(%arg0: i32) -> (i32, i32, i32) {
    %c0_i32 = arith.constant 0 : i32
    %c0_i32_0 = arith.constant 0 : i32
    %c0_i32_1 = arith.constant 0 : i32
    %c0_i32_2 = arith.constant 0 : i32
    return %c0_i32, %c0_i32_0, %c0_i32_1 : i32, i32, i32
  }
  func.func @transform_3(%arg0: i32) -> (i32, i32, i32) {
    %c0_i32 = arith.constant 0 : i32
    %c0_i32_0 = arith.constant 0 : i32
    %c0_i32_1 = arith.constant 0 : i32
    %c0_i32_2 = arith.constant 0 : i32
    return %c0_i32, %c0_i32_0, %c0_i32_1 : i32, i32, i32
  }
  func.func @transform_4(%arg0: i32) -> (i32, i32, i32) {
    %c0_i32 = arith.constant 0 : i32
    %c0_i32_0 = arith.constant 0 : i32
    %c0_i32_1 = arith.constant 0 : i32
    %c0_i32_2 = arith.constant 0 : i32
    return %c0_i32, %c0_i32_0, %c0_i32_1 : i32, i32, i32
  }
  func.func @transform_5(%arg0: i32) -> (i32, i32, i32) {
    %c0_i32 = arith.constant 0 : i32
    %c0_i32_0 = arith.constant 0 : i32
    %c0_i32_1 = arith.constant 0 : i32
    %c0_i32_2 = arith.constant 0 : i32
    return %c0_i32, %c0_i32_0, %c0_i32_1 : i32, i32, i32
  }
  func.func @transform_6(%arg0: i32) -> (i32, i32, i32) {
    %c0_i32 = arith.constant 0 : i32
    %c0_i32_0 = arith.constant 0 : i32
    %c0_i32_1 = arith.constant 0 : i32
    %c0_i32_2 = arith.constant 0 : i32
    return %c0_i32, %c0_i32_0, %c0_i32_1 : i32, i32, i32
  }
  func.func @transform_7(%arg0: i32) -> (i32, i32, i32) {
    %c0_i32 = arith.constant 0 : i32
    %c0_i32_0 = arith.constant 0 : i32
    %c0_i32_1 = arith.constant 0 : i32
    %c0_i32_2 = arith.constant 0 : i32
    return %c0_i32, %c0_i32_0, %c0_i32_1 : i32, i32, i32
  }
  func.func @transform_8(%arg0: i32) -> (i32, i32, i32) {
    %c0_i32 = arith.constant 0 : i32
    %c0_i32_0 = arith.constant 0 : i32
    %c0_i32_1 = arith.constant 0 : i32
    %c0_i32_2 = arith.constant 0 : i32
    return %c0_i32, %c0_i32_0, %c0_i32_1 : i32, i32, i32
  }
  func.func @transform_9(%arg0: i32) -> (i32, i32) {
    %c0_i32 = arith.constant 0 : i32
    %c0_i32_0 = arith.constant 0 : i32
    %c0_i32_1 = arith.constant 0 : i32
    return %c0_i32, %c0_i32_0 : i32, i32
  }
  func.func @transform_10(%arg0: i32) -> (i32, i32, i32) {
    %c0_i32 = arith.constant 0 : i32
    %c0_i32_0 = arith.constant 0 : i32
    %c0_i32_1 = arith.constant 0 : i32
    return %arg0, %c0_i32, %c0_i32_0 : i32, i32, i32
  }
}

</mosaic_0001>

<bundles_post_ra>
// kernel: tpu_custom_call.1
= control target key start
LH: loop header
LB: loop body
LE: loop exit
PB: predicated region body
PF: predicated region fallthrough
CT: control target
= control target key end

     0   :  { %15 = vsyncpa [#allocation3], 0  ;;  %s3226_s0 = inlined_call_operand.vmem [shape: f32[2,8,24], index: 0, kind: input, shape index: {}]   ;;  %s3227_s1 = inlined_call_operand.vmem [shape: f32[2,8,16], index: 1, kind: input, shape index: {}]   ;;  %s3228_s2 = inlined_call_operand.vmem [shape: f32[4,24,8], index: 2, kind: input, shape index: {}]   ;;  %s3229_s3 = inlined_call_operand.vmem [shape: f32[4,1,8], index: 3, kind: input, shape index: {}]   ;;  %s3230_s4 = inlined_call_operand.vmem [shape: f32[4,16,8], index: 4, kind: input, shape index: {}]   ;;  %s3231_s5 = inlined_call_operand.vmem [shape: f32[4,1,8], index: 5, kind: input, shape index: {}]   ;;  %s3232_s6 = inlined_call_operand.vmem [shape: f32[4,16,8], index: 6, kind: input, shape index: {}]   ;;  %s3233_s7 = inlined_call_operand.vmem [shape: f32[4,1,8], index: 7, kind: input, shape index: {}]   ;;  %s3234_s8 = inlined_call_operand.vmem [shape: f32[4,8,32], index: 8, kind: input, shape index: {}]   ;;  %s3235_s9 = inlined_call_operand.vmem [shape: f32[1,32], index: 9, kind: input, shape index: {}]   ;;  %s3236_s10 = inlined_call_operand.hbm [shape: f32[2,8,32], index: 10, kind: output, shape index: {}]  }
   0x1   :  { %17 = vsyncpa [#allocation3 + $0x1], 0  ;;  %s2862_s13 = smov 0   ;;  %s2864_s14 = smov 0  }
   0x2   :  { %s2866_s15 = smov 0   ;;  %s2868_s16 = smov 0  }
   0x3 LB: > { %s2883_s17 = sadd.s32 4294967295, %s2801_s16   ;;  %s2377_s18 = sadd.s32 4294967294, %s2801_s16   ;;  %s2801_s16 = sphi %s2868_s16, %s3244_s16   ;;  %s2797_s15 = sphi %s2866_s15, %s3243_s15   ;;  %s2793_s14 = sphi %s2864_s14, %s3242_s14   ;;  %s2789_s13 = sphi %s2862_s13, %s3241_s13  }
   0x4   : > { %s2887_s19 = sadd.s32 1, %s2801_s16   ;;  %s250_s20 = sadd.s32 1, %s2797_s15 }
   0x5   : > { %s247_s21 = ssub.s32 %s2801_s16, %s2887_s19  ;;  %p260_p0 = scmp.ne.s32.totalorder %s2797_s15, %s2793_s14 }
   0x6   : > { %p248_p1 = scmp.eq.s32.totalorder %s247_s21, 0  ;;  %p261_p2 = scmp.eq.s32.totalorder %s2883_s17, 1 }
   0x7   : > { %p266_p3 = scmp.ne.s32.totalorder %s2793_s14, %s2789_s13  ;;  %p267_p4 = scmp.eq.s32.totalorder %s2377_s18, 1 }
   0x8   : > { %s2898_s22 = scalar_select %p248_p1, %s2797_s15, %s250_s20  }
   0x9   : > { %p2900_p5 = por %p261_p2, %p260_p0  ;;  %p2904_p6 = por %p267_p4, %p266_p3 }
   0xa   : > { %3237 = sst [smem:[#allocation5_spill]] %s2898_s22  ;;  %p2380_p7 = scmp.ge.s32.totalorder %s2801_s16, 1 }
   0xb   : > { %p323_p8 = scmp.lt.s32.totalorder %s2801_s16, 3 }
   0xd   : > { %p324_p9 = pnand %p2380_p7, %p323_p8 }
   0xe   : > { %v374_v0 = vld [vmem:[%s3228_s2] sm:$0xff] (!%p324_p9)  ;;  %v375_v1 = vld [vmem:[%s3228_s2 + $0x8] sm:$0xff] (!%p324_p9)  ;;  %v377_v2 = vld [vmem:[%s3228_s2 + $0x18] sm:$0xff] (!%p324_p9)  ;;  %v2803_v3 = vmov (!%p324_p9), 0.0|0.0   ;;  %p364_p10 = scmp.lt.s32.totalorder (!%p324_p9), %s2883_s17, 1  ;;  %vm2804_vm0 = vmmov (!%p324_p9), 0  }
   0xf   : > { %327 = sbr.rel (%p324_p9) target bundleno = 1234 (0x4d2), region = 60  ;;  %2645 = vmatprep.subr.bf16.mxu0 (!%p324_p9), %v2803_v3  ;;  %2648 = vmatprep.subr.bf16.mxu1 (!%p324_p9), %v2803_v3  ;;  %v2646_v4 = vpack.c.bf16 (!%p324_p9), %v375_v1, %v374_v0  ;;  %v378_v5 = vld [vmem:[%s3228_s2 + $0x20] sm:$0xff] (!%p324_p9)  ;;  %v2805_v7 = vmov (!%p324_p9), 0.0   ;;  %v380_v8 = vld [vmem:[%s3228_s2 + $0x30] sm:$0xff] (!%p324_p9)  ;;  %v381_v9 = vld [vmem:[%s3228_s2 + $0x38] sm:$0xff] (!%p324_p9)  ;;  %vm414_vm1 = vcmask (!%p324_p9), 195584  }
  0x10   : > { %v2649_v6 = vpack.c.bf16 (!%p324_p9), %v378_v5, %v377_v2  ;;  %2499 = vmatprep.mubr.msk.f32.mxu0 (!%p324_p9), %vm2804_vm0, %v2805_v7  ;;  %2508 = vmatprep.mubr.msk.f32.mxu1 (!%p324_p9), %vm2804_vm0, %v2805_v7  ;;  %v376_v10 = vld [vmem:[%s3228_s2 + $0x10] sm:$0xff] (!%p324_p9)  ;;  %v383_v11 = vld [vmem:[%s3228_s2 + $0x48] sm:$0xff] (!%p324_p9)  ;;  %v2652_v14 = vpack.c.bf16 (!%p324_p9), %v381_v9, %v380_v8  ;;  %v698_v17 = vld [vmem:[%s3230_s4] sm:$0xff] (!%p324_p9)  ;;  %vm734_vm2 = vcmask (!%p324_p9), 130048   ;;  %vm1334_vm3 = vcmask (!%p324_p9), 64512   ;;  %s2426_s30 = sshll.u32 (!%p324_p9), %s2883_s17, 7 }
  0x11   : > { %2647 = vmatpush3.bf16.msra.mxu0 (!%p324_p9), %v2646_v4  ;;  %v384_v12 = vld [vmem:[%s3228_s2 + $0x50] sm:$0xff] (!%p324_p9)  ;;  %v379_v13 = vld [vmem:[%s3228_s2 + $0x28] sm:$0xff] (!%p324_p9)  ;;  %v382_v19 = vld [vmem:[%s3228_s2 + $0x40] sm:$0xff] (!%p324_p9)  ;;  %vm2275_vm4 = vcmask (!%p324_p9), 261120   ;;  %s3183_s26 = scalar_lea.hbm (!%p324_p9), %s3236_s10, %s2426_s30 }
  0x12   : > { %2650 = vmatpush3.bf16.msra.mxu1 (!%p324_p9), %v2649_v6  ;;  %2497 = vmatprep.subr.mxu0 (!%p324_p9), %v2805_v7  ;;  %v2655_v16 = vpack.c.bf16 (!%p324_p9), %v384_v12, %v383_v11  ;;  %v699_v18 = vld [vmem:[%s3230_s4 + $0x8] sm:$0xff] (!%p324_p9)  ;;  %v700_v20 = vld [vmem:[%s3230_s4 + $0x10] sm:$0xff] (!%p324_p9)  ;;  %v701_v21 = vld [vmem:[%s3230_s4 + $0x18] sm:$0xff] (!%p324_p9) }
  0x13   : > { %2506 = vmatprep.subr.mxu1 (!%p324_p9), %v2805_v7  ;;  %v385_v22 = vld [vmem:[%s3228_s2 + $0x58] sm:$0xff] (!%p324_p9)  ;;  %v2658_v23 = vpack.c.bf16 (!%p324_p9), %v699_v18, %v698_v17  ;;  %v2661_v24 = vpack.c.bf16 (!%p324_p9), %v701_v21, %v700_v20  ;;  %v702_v25 = vld [vmem:[%s3230_s4 + $0x20] sm:$0xff] (!%p324_p9)  ;;  %v703_v26 = vld [vmem:[%s3230_s4 + $0x28] sm:$0xff] (!%p324_p9) }
  0x14   : > { %v704_v27 = vld [vmem:[%s3230_s4 + $0x30] sm:$0xff] (!%p324_p9)  ;;  %v705_v28 = vld [vmem:[%s3230_s4 + $0x38] sm:$0xff] (!%p324_p9)  ;;  %v2664_v30 = vpack.c.bf16 (!%p324_p9), %v703_v26, %v702_v25  ;;  %v1018_v32 = vld [vmem:[%s3232_s6] sm:$0xff] (!%p324_p9) }
  0x15   : > { %2498 = vmatpush3.msra.mxu0 (!%p324_p9), %v376_v10  ;;  %v2667_v31 = vpack.c.bf16 (!%p324_p9), %v705_v28, %v704_v27  ;;  %v1019_v33 = vld [vmem:[%s3232_s6 + $0x8] sm:$0xff] (!%p324_p9)  ;;  %v1020_v34 = vld [vmem:[%s3232_s6 + $0x10] sm:$0xff] (!%p324_p9)  ;;  %v1021_v36 = vld [vmem:[%s3232_s6 + $0x18] sm:$0xff] (!%p324_p9) }
  0x16   : > { %s2930_s18 = scalar_select %p364_p10, %s2883_s17, 1  ;;  %2507 = vmatpush3.msra.mxu1 %v379_v13  ;;  %2651 = vmatprep.subr.bf16.mxu0 %v2803_v3  ;;  %v2670_v35 = vpack.c.bf16 %v1019_v33, %v1018_v32  ;;  %v2673_v37 = vpack.c.bf16 %v1021_v36, %v1020_v34  ;;  %v1022_v38 = vld [vmem:[%s3232_s6 + $0x20] sm:$0xff]  ;;  %v1023_v39 = vld [vmem:[%s3232_s6 + $0x28] sm:$0xff]  ;;  %v1024_v40 = vld [vmem:[%s3232_s6 + $0x30] sm:$0xff] }
  0x17   : > { %2654 = vmatprep.subr.bf16.mxu1 %v2803_v3  ;;  %v2676_v41 = vpack.c.bf16 %v1023_v39, %v1022_v38  ;;  %v1025_v42 = vld [vmem:[%s3232_s6 + $0x38] sm:$0xff]  ;;  %v2392_v52 = vld [vmem:[%s3231_s5] ss:$0 sm:$0xff]  ;;  %v2393_v53 = vld [vmem:[%s3231_s5 + $0x1] ss:$0 sm:$0xff]  ;;  %s2806_s17 = smov [#allocation2]  }
  0x18   : > { %s2382_s25 = sshll.u32 %s2930_s18, 3  ;;  %v2679_v43 = vpack.c.bf16 %v1025_v42, %v1024_v40  ;;  %v2384_v55 = vld [vmem:[%s3229_s3] ss:$0 sm:$0xff]  ;;  %v2385_v59 = vld [vmem:[%s3229_s3 + $0x1] ss:$0 sm:$0xff] }
  0x19   : > { %s367_s27 = scalar_lea.vmem %s3226_s0, %s2382_s25  ;;  %s371_s29 = scalar_lea.vmem %s3227_s1, %s2382_s25  ;;  %v2394_v62 = vld [vmem:[%s3231_s5 + $0x2] ss:$0 sm:$0xff]  ;;  %v2395_v63 = vld [vmem:[%s3231_s5 + $0x3] ss:$0 sm:$0xff]  ;;  %v2400_v13 = vld [vmem:[%s3233_s7] ss:$0 sm:$0xff] }
  0x1a   : > { %v372_v15 = vld [vmem:[%s367_s27] sm:$0xff]  ;;  %s361_s25 = sand.u32 1, %s2793_s14  }
  0x1b   : > { %2500 = vmatmul.mubr.msk.f32.vlgmr.msra.gmra.mrb[0].mxu0 %vm414_vm1, %v372_v15  ;;  %2509 = vmatmul.mubr.msk.f32.vlgmr.msra.gmra.mrb[0].mxu1 %vm414_vm1, %v372_v15  ;;  %v373_v29 = vld [vmem:[%s371_s29] sm:$0xff]  ;;  %s2381_s28 = sshll.u32 %s361_s25, 3  ;;  %s2293_s27 = scalar_lea.sflag [#allocation3], %s361_s25 }
  0x1c   : > { %2653 = vmatpush3.bf16.msra.mxu0 %v2652_v14  ;;  %2656 = vmatpush3.bf16.msra.mxu1 %v2655_v16  ;;  %v2387_v8 = vld [vmem:[%s3229_s3 + $0x3] ss:$0 sm:$0xff]  ;;  %v2401_v14 = vld [vmem:[%s3233_s7 + $0x1] ss:$0 sm:$0xff]  ;;  %s363_s11 = scalar_lea.vmem [#allocation2], %s2381_s28  ;;  %s2743_s28 = sshll.u32 %s2806_s17, 4  ;;  %s2744_s28 = int_to_ptr.vmem [resolvable:$false] %s2743_s28 }
  0x1d   : > { %2515 = vmatprep.subr.mxu0 %v2805_v7  ;;  %2524 = vmatprep.subr.mxu1 %v2805_v7  ;;  %s2306_s12 = sshll.u32 %s363_s11, 4  ;;  %s2745_s22 = scalar_lea.vmem %s2744_s28, 256  ;;  %s3185_s12 = int_to_ptr.vmem [resolvable:$true] %s2306_s12 }
  0x1e   : > { %2517 = vmatprep.mubr.msk.f32.mxu0 %vm2804_vm0, %v2805_v7  ;;  %2526 = vmatprep.mubr.msk.f32.mxu1 %vm2804_vm0, %v2805_v7  ;;  %s2739_s18 = scalar_lea.vmem %s3185_s12, 128  ;;  %p2746_p0 = scmp.lt.s32.totalorder %s3185_s12, %s2744_s28 }
  0x1f   : > { %p2740_p11 = scmp.ne.s32.totalorder %s3185_s12, %s2739_s18  ;;  %p2747_p1 = scmp.lt.s32.totalorder %s2745_s22, %s2739_s18 }
  0x20   : > { %2516 = vmatpush3.msra.mxu0 %v382_v19  ;;  %2525 = vmatpush3.msra.mxu1 %v385_v22 }
  0x21   : > { %2518 = vmatmul.mubr.msk.f32.vlgmr.msra.gmra.mrb[2].mxu0 %vm414_vm1, %v372_v15  ;;  %2527 = vmatmul.mubr.msk.f32.vlgmr.msra.gmra.mrb[2].mxu1 %vm414_vm1, %v372_v15  ;;  %p2741_p12 = pnand %p2740_p11, %p2900_p5  ;;  %p2748_p2 = por %p2747_p1, %p2746_p0 }
  0x22   : > { %2657 = vmatprep.subr.bf16.mxu0 %v2803_v3  ;;  %2660 = vmatprep.subr.bf16.mxu1 %v2803_v3 }
  0x23   : > { %2659 = vmatpush3.bf16.msra.mxu0 %v2658_v23  ;;  %2662 = vmatpush3.bf16.msra.mxu1 %v2661_v24  ;;  %p2742_p13 = pneg %p2741_p12 }
  0x24   : > { %2533 = vmatprep.mubr.msk.f32.mxu0 %vm2804_vm0, %v2805_v7  ;;  %2540 = vmatprep.mubr.msk.f32.mxu1 %vm2804_vm0, %v2805_v7 }
  0x25   : > { %2663 = vmatprep.subr.bf16.mxu0 %v2803_v3  ;;  %2666 = vmatprep.subr.bf16.mxu1 %v2803_v3  ;;  %p2749_p3 = pnand %p2748_p2, %p2742_p13 }
  0x26   : > { %2534 = vmatmul.mubr.msk.f32.vlgmr.msra.gmra.mrb[4].mxu0 %vm734_vm2, %v373_v29  ;;  %2541 = vmatmul.mubr.msk.f32.vlgmr.msra.gmra.mrb[4].mxu1 %vm734_vm2, %v373_v29 }
  0x27   : > { %2665 = vmatpush3.bf16.msra.mxu0 %v2664_v30  ;;  %2668 = vmatpush3.bf16.msra.mxu1 %v2667_v31 }
  0x28   : > { %2547 = vmatprep.mubr.msk.f32.mxu0 %vm2804_vm0, %v2805_v7  ;;  %2554 = vmatprep.mubr.msk.f32.mxu1 %vm2804_vm0, %v2805_v7 }
  0x29   : > { %2669 = vmatprep.subr.bf16.mxu0 %v2803_v3  ;;  %2672 = vmatprep.subr.bf16.mxu1 %v2803_v3 }
  0x2a   : > { %2548 = vmatmul.mubr.msk.f32.vlgmr.msra.gmra.mrb[6].mxu0 %vm734_vm2, %v373_v29  ;;  %2555 = vmatmul.mubr.msk.f32.vlgmr.msra.gmra.mrb[6].mxu1 %vm734_vm2, %v373_v29 }
  0x2b   : > { %2561 = vmatprep.mubr.msk.f32.mxu0 %vm2804_vm0, %v2805_v7  ;;  %2568 = vmatprep.mubr.msk.f32.mxu1 %vm2804_vm0, %v2805_v7 }
  0x2c   : > { %2671 = vmatpush3.bf16.msra.mxu0 %v2670_v35  ;;  %2674 = vmatpush3.bf16.msra.mxu1 %v2673_v37 }
  0x2d   : > { %2675 = vmatprep.subr.bf16.mxu0 %v2803_v3  ;;  %2678 = vmatprep.subr.bf16.mxu1 %v2803_v3  ;;  %v2386_v3 = vld [vmem:[%s3229_s3 + $0x2] ss:$0 sm:$0xff] }
  0x2f   : > { %2562 = vmatmul.mubr.msk.f32.vlgmr.msra.gmra.mrb[8].mxu0 %vm734_vm2, %v373_v29  ;;  %2569 = vmatmul.mubr.msk.f32.vlgmr.msra.gmra.mrb[8].mxu1 %vm734_vm2, %v373_v29 }
  0x30   : > { %2677 = vmatpush3.bf16.msra.mxu0 %v2676_v41  ;;  %2680 = vmatpush3.bf16.msra.mxu1 %v2679_v43 }
  0x31   : > { %2575 = vmatprep.mubr.msk.f32.mxu0 %vm2804_vm0, %v2805_v7  ;;  %2582 = vmatprep.mubr.msk.f32.mxu1 %vm2804_vm0, %v2805_v7 }
  0x32   : > { %2585 = vmatprep.subr.mxu0 %v2805_v7  ;;  %2590 = vmatprep.subr.mxu1 %v2805_v7 }
  0x33   : > { %2576 = vmatmul.mubr.msk.f32.vlgmr.msra.gmra.mrb[10].mxu0 %vm734_vm2, %v373_v29  ;;  %2583 = vmatmul.mubr.msk.f32.vlgmr.msra.gmra.mrb[10].mxu1 %vm734_vm2, %v373_v29 }
  0x34   : > { %2587 = vmatprep.mubr.msk.f32.mxu0 %vm2804_vm0, %v2805_v7  ;;  %2592 = vmatprep.mubr.msk.f32.mxu1 %vm2804_vm0, %v2805_v7 }
  0xee   : > { %v484_v44 = vpop.f32.mrb[0].mxu0  ;;  %v554_v46 = vpop.f32.mrb[0].mxu1 }
  0xef   : > { %v2501_v45 = vpop.f32.mrb[1].mxu0  ;;  %v2510_v47 = vpop.f32.mrb[1].mxu1  ;;  %v485_v0 = vadd.f32 %v2384_v55, %v484_v44  ;;  %v555_v2 = vadd.f32 %v2385_v59, %v554_v46 }
  0xf4   : > { %v624_v48 = vpop.f32.mrb[2].mxu0  ;;  %v694_v50 = vpop.f32.mrb[2].mxu1 }
  0xf5   : > { %v2519_v49 = vpop.f32.mrb[3].mxu0  ;;  %v2528_v51 = vpop.f32.mrb[3].mxu1  ;;  %v625_v11 = vadd.f32 %v2386_v3, %v624_v48  ;;  %v695_v12 = vadd.f32 %v2387_v8, %v694_v50 }
  0xf9   : > { %v804_v54 = vpop.f32.mrb[4].mxu0  ;;  %v874_v57 = vpop.f32.mrb[4].mxu1 }
  0xfa   : > { %v805_v56 = vadd.f32 %v2392_v52, %v804_v54  ;;  %v2535_v58 = vpop.f32.mrb[5].mxu0  ;;  %v875_v60 = vadd.f32 %v2393_v53, %v874_v57  ;;  %v2542_v61 = vpop.f32.mrb[5].mxu1 }
  0xfc   : > { %2586 = vmatpush3.xpose.msk.msra.mxu0 %vm1334_vm3, %v805_v56  ;;  %2591 = vmatpush3.xpose.msk.msra.mxu1 %vm1334_vm3, %v875_v60 }
  0xfd   : > { %v944_v1 = vpop.f32.mrb[6].mxu0  ;;  %2595 = vmatprep.subr.mxu0 %v2805_v7  ;;  %v1014_v5 = vpop.f32.mrb[6].mxu1  ;;  %2600 = vmatprep.subr.mxu1 %v2805_v7 }
  0xfe   : > { %v945_v4 = vadd.f32 %v2394_v62, %v944_v1  ;;  %v2549_v6 = vpop.f32.mrb[7].mxu0  ;;  %v1015_v9 = vadd.f32 %v2395_v63, %v1014_v5  ;;  %v2556_v10 = vpop.f32.mrb[7].mxu1  ;;  %v2402_v1 = vld [vmem:[%s3233_s7 + $0x2] ss:$0 sm:$0xff]  ;;  %v2403_v5 = vld [vmem:[%s3233_s7 + $0x3] ss:$0 sm:$0xff] }
  0xff   : > { %2588 = vmatmul.mubr.msk.f32.vlgmr.msra.gmra.mrb[12].mxu0 %vm1334_vm3, %v485_v0  ;;  %2593 = vmatmul.mubr.msk.f32.vlgmr.msra.gmra.mrb[12].mxu1 %vm1334_vm3, %v555_v2 }
 0x100   : > { %2596 = vmatpush3.xpose.msk.msra.mxu0 %vm1334_vm3, %v945_v4  ;;  %2601 = vmatpush3.xpose.msk.msra.mxu1 %vm1334_vm3, %v1015_v9 }
 0x101   : > { %2597 = vmatprep.mubr.msk.f32.mxu0 %vm2804_vm0, %v2805_v7  ;;  %2602 = vmatprep.mubr.msk.f32.mxu1 %vm2804_vm0, %v2805_v7 }
 0x102   : > { %2605 = vmatprep.subr.mxu0 %v2805_v7  ;;  %2610 = vmatprep.subr.mxu1 %v2805_v7  ;;  %v1120_v15 = vpop.f32.mrb[8].mxu0  ;;  %v1190_v18 = vpop.f32.mrb[8].mxu1 }
 0x103   : > { %2598 = vmatmul.mubr.msk.f32.vlgmr.msra.gmra.mrb[14].mxu0 %vm1334_vm3, %v625_v11  ;;  %2603 = vmatmul.mubr.msk.f32.vlgmr.msra.gmra.mrb[14].mxu1 %vm1334_vm3, %v695_v12  ;;  %v1121_v16 = vadd.f32 %v2400_v13, %v1120_v15  ;;  %v2563_v17 = vpop.f32.mrb[9].mxu0  ;;  %v1191_v19 = vadd.f32 %v2401_v14, %v1190_v18  ;;  %v2570_v20 = vpop.f32.mrb[9].mxu1  ;;  %v1979_v14 = vld [vmem:[%s3234_s8] sm:$0xff]  ;;  %v1980_v15 = vld [vmem:[%s3234_s8 + $0x8] sm:$0xff] }
 0x104   : > { %2607 = vmatprep.mubr.msk.f32.mxu0 %vm2804_vm0, %v2805_v7  ;;  %2612 = vmatprep.mubr.msk.f32.mxu1 %vm2804_vm0, %v2805_v7 }
 0x105   : > { %2606 = vmatpush3.msra.mxu0 %v1121_v16  ;;  %2611 = vmatpush3.msra.mxu1 %v1191_v19  ;;  %v1981_v16 = vld [vmem:[%s3234_s8 + $0x10] sm:$0xff]  ;;  %v1982_v19 = vld [vmem:[%s3234_s8 + $0x18] sm:$0xff] }
 0x106   : > { %v3113_v21 = vpop.f32.mrb[10].mxu0  ;;  %2615 = vmatprep.subr.mxu0 %v2805_v7  ;;  %v3116_v23 = vpop.f32.mrb[10].mxu1  ;;  %2620 = vmatprep.subr.mxu1 %v2805_v7 }
 0x107   : > { %v2577_v22 = vpop.f32.mrb[11].mxu0  ;;  %v2584_v24 = vpop.f32.mrb[11].mxu1  ;;  %v1261_v4 = vadd.f32 %v2402_v1, %v3113_v21  ;;  %v1331_v10 = vadd.f32 %v2403_v5, %v3116_v23 }
 0x1d2   : > { %v1407_v25 = vpop.f32.mrb[12].mxu0  ;;  %v1483_v27 = vpop.f32.mrb[12].mxu1 }
 0x1d3   : > { %v1639_v26 = vmul.f32 0.25, %v1407_v25  ;;  %v2589_v28 = vpop.f32.mrb[13].mxu0  ;;  %v2594_v29 = vpop.f32.mrb[13].mxu1  ;;  %v1640_v30 = vmul.f32 0.25, %v1483_v27 }
 0x1d5   : > { %v1643_v31 = vsel %vm1334_vm3, %v1639_v26, -inf  ;;  %v1646_v38 = vsel %vm1334_vm3, %v1640_v30, -inf }
 0x1d6   : > { %1644 = vmax.xlane.f32.xlu0 %v1643_v31  ;;  %v1559_v32 = vpop.f32.mrb[14].mxu0  ;;  %v1635_v33 = vpop.f32.mrb[14].mxu1 }
 0x1d7   : > { %v1641_v34 = vmul.f32 0.25, %v1559_v32  ;;  %v2599_v35 = vpop.f32.mrb[15].mxu0  ;;  %v2604_v36 = vpop.f32.mrb[15].mxu1  ;;  %v1642_v37 = vmul.f32 0.25, %v1635_v33 }
 0x1d9   : > { %v1649_v39 = vsel %vm1334_vm3, %v1641_v34, -inf  ;;  %v1652_v40 = vsel %vm1334_vm3, %v1642_v37, -inf }
 0x1da   : > { %1647 = vmax.xlane.f32.xlu0 %v1646_v38  ;;  %1650 = vmax.xlane.f32.xlu1 %v1649_v39  ;;  %v2424_v38 = vld [vmem:[%s3235_s9] ss:$0 sm:$0xff] }
 0x1de   : > { %1653 = vmax.xlane.f32.xlu1 %v1652_v40 }
 0x263   : > { %v1645_v41 = vpop.xlane.xlu0 %1644 }
 0x264   : > { %v1655_v42 = vsub.f32 %v1639_v26, %v1645_v41 }
 0x266   : > { %v1659_v43 = vmul.f32 1.442695, %v1655_v42 }
 0x267   : > { %v1648_v44 = vpop.xlane.xlu0 %1647  ;;  %v1651_v45 = vpop.xlane.xlu1 %1650 }
 0x268   : > { %2723 = vpow2.f32 %v1659_v43  ;;  %v1656_v46 = vsub.f32 %v1640_v30, %v1648_v44  ;;  %v1657_v47 = vsub.f32 %v1641_v34, %v1651_v45 }
 0x26a   : > { %v1661_v48 = vmul.f32 1.442695, %v1656_v46  ;;  %v1663_v49 = vmul.f32 1.442695, %v1657_v47 }
 0x26b   : > { %v1654_v50 = vpop.xlane.xlu1 %1653 }
 0x26c   : > { %2725 = vpow2.f32 %v1661_v48  ;;  %v1658_v51 = vsub.f32 %v1642_v37, %v1654_v50 }
 0x26d   : > { %2727 = vpow2.f32 %v1663_v49 }
 0x26e   : > { %v1665_v52 = vmul.f32 1.442695, %v1658_v51 }
 0x270   : > { %2729 = vpow2.f32 %v1665_v52 }
 0x272   : > { %v2724_v53 = vpop.eup %2723 }
 0x273   : > { %v1667_v54 = vsel %vm1334_vm3, %v2724_v53, 0.0 }
 0x274   : > { %1668 = vadd.xlane.f32.xlu0 %v1667_v54 }
 0x276   : > { %v2726_v55 = vpop.eup %2725 }
 0x277   : > { %v2728_v56 = vpop.eup %2727  ;;  %v1670_v57 = vsel %vm1334_vm3, %v2726_v55, 0.0 }
 0x278   : > { %1671 = vadd.xlane.f32.xlu1 %v1670_v57  ;;  %v1673_v58 = vsel %vm1334_vm3, %v2728_v56, 0.0 }
 0x279   : > { %1674 = vadd.xlane.f32.xlu0 %v1673_v58 }
 0x27a   : > { %v2730_v59 = vpop.eup %2729 }
 0x27b   : > { %v1676_v60 = vsel %vm1334_vm3, %v2730_v59, 0.0 }
 0x27c   : > { %1677 = vadd.xlane.f32.xlu1 %v1676_v60 }
 0x301   : > { %v1669_v61 = vpop.xlane.xlu0 %1668 }
 0x302   : > { %2731 = vrcp.f32 %v1669_v61 }
 0x305   : > { %v1672_v62 = vpop.xlane.xlu1 %1671 }
 0x306   : > { %v1675_v63 = vpop.xlane.xlu0 %1674  ;;  %2733 = vrcp.f32 %v1672_v62 }
 0x307   : > { %2735 = vrcp.f32 %v1675_v63 }
 0x309   : > { %v1678_v0 = vpop.xlane.xlu1 %1677 }
 0x30a   : > { %2737 = vrcp.f32 %v1678_v0 }
 0x30c   : > { %v2732_v2 = vpop.eup %2731 }
 0x30d   : > { %v1683_v3 = vmul.f32 %v2732_v2, %v2724_v53 }
 0x30f   : > { %2608 = vmatmul.mubr.msk.f32.vlgmr.msra.gmra.mrb[16].mxu0 %vm1334_vm3, %v1683_v3 }
 0x310   : > { %v2734_v6 = vpop.eup %2733  ;;  %2616 = vmatpush3.msra.mxu0 %v1261_v4  ;;  %2617 = vmatprep.mubr.msk.f32.mxu0 %vm2804_vm0, %v2805_v7 }
 0x311   : > { %v2736_v8 = vpop.eup %2735  ;;  %v1684_v9 = vmul.f32 %v2734_v6, %v2726_v55  ;;  %2625 = vmatprep.subr.mxu0 %v2805_v7 }
 0x312   : > { %v1685_v11 = vmul.f32 %v2736_v8, %v2728_v56 }
 0x313   : > { %2613 = vmatmul.mubr.msk.f32.vlgmr.msra.gmra.mrb[16].mxu1 %vm1334_vm3, %v1684_v9 }
 0x314   : > { %v2738_v12 = vpop.eup %2737  ;;  %2618 = vmatmul.mubr.msk.f32.vlgmr.msra.gmra.mrb[18].mxu0 %vm1334_vm3, %v1685_v11  ;;  %2621 = vmatpush3.msra.mxu1 %v1331_v10 }
 0x315   : > { %v1686_v13 = vmul.f32 %v2738_v12, %v2730_v59  ;;  %2622 = vmatprep.mubr.msk.f32.mxu1 %vm2804_vm0, %v2805_v7  ;;  %2627 = vmatprep.mubr.msk.f32.mxu0 %vm2804_vm0, %v2805_v7 }
 0x316   : > { %2630 = vmatprep.subr.mxu1 %v2805_v7  ;;  %2626 = vmatpush3.msra.mxu0 %v1979_v14 }
 0x317   : > { %2623 = vmatmul.mubr.msk.f32.vlgmr.msra.gmra.mrb[18].mxu1 %vm1334_vm3, %v1686_v13  ;;  %2635 = vmatprep.subr.mxu0 %v2805_v7 }
 0x318   : > { %2632 = vmatprep.mubr.msk.f32.mxu1 %vm2804_vm0, %v2805_v7  ;;  %2631 = vmatpush3.msra.mxu1 %v1980_v15 }
 0x319   : > { %2640 = vmatprep.subr.mxu1 %v2805_v7 }
 0x3e2   : > { %v1756_v17 = vpop.f32.mrb[16].mxu0 }
 0x3e3   : > { %v2609_v18 = vpop.f32.mrb[17].mxu0  ;;  %2628 = vmatmul.mubr.msk.f32.vlgmr.msra.gmra.mrb[20].mxu0 %vm1334_vm3, %v1756_v17 }
 0x3e4   : > { %2636 = vmatpush3.msra.mxu0 %v1981_v16  ;;  %2637 = vmatprep.mubr.msk.f32.mxu0 %vm2804_vm0, %v2805_v7 }
 0x3e6   : > { %v1829_v20 = vpop.f32.mrb[16].mxu1 }
 0x3e7   : > { %v1902_v21 = vpop.f32.mrb[18].mxu0  ;;  %v2614_v22 = vpop.f32.mrb[17].mxu1  ;;  %2633 = vmatmul.mubr.msk.f32.vlgmr.msra.gmra.mrb[20].mxu1 %vm1334_vm3, %v1829_v20 }
 0x3e8   : > { %v2619_v23 = vpop.f32.mrb[19].mxu0  ;;  %2638 = vmatmul.mubr.msk.f32.vlgmr.msra.gmra.mrb[22].mxu0 %vm1334_vm3, %v1902_v21  ;;  %2641 = vmatpush3.msra.mxu1 %v1982_v19 }
 0x3e9   : > { %2642 = vmatprep.mubr.msk.f32.mxu1 %vm2804_vm0, %v2805_v7 }
 0x3ea   : > { %v1975_v24 = vpop.f32.mrb[18].mxu1 }
 0x3eb   : > { %v2624_v25 = vpop.f32.mrb[19].mxu1  ;;  %2643 = vmatmul.mubr.msk.f32.vlgmr.msra.gmra.mrb[22].mxu1 %vm1334_vm3, %v1975_v24 }
 0x4b6   : > { %v2052_v26 = vpop.f32.mrb[20].mxu0 }
 0x4b7   : > { %v2629_v27 = vpop.f32.mrb[21].mxu0  ;;  %v2276_v29 = vsel %vm2275_vm4, %v2052_v26, 0.0 }
 0x4ba   : > { %v2125_v28 = vpop.f32.mrb[20].mxu1 }
 0x4bb   : > { %v2277_v30 = vsel %vm2275_vm4, %v2125_v28, 0.0  ;;  %v2198_v31 = vpop.f32.mrb[22].mxu0  ;;  %v2634_v32 = vpop.f32.mrb[21].mxu1 }
 0x4bc   : > { %v2278_v33 = vadd.f32 %v2277_v30, %v2276_v29  ;;  %v2639_v34 = vpop.f32.mrb[23].mxu0  ;;  %v2279_v7 = vsel %vm2275_vm4, %v2198_v31, 0.0 }
 0x4be   : > { %v2280_v35 = vadd.f32 %v2279_v7, %v2278_v33  ;;  %v2271_v36 = vpop.f32.mrb[22].mxu1 }
 0x4bf   : > { %v2281_v37 = vsel %vm2275_vm4, %v2271_v36, 0.0  ;;  %v2644_v39 = vpop.f32.mrb[23].mxu1 }
 0x4c0   : > { %v2282_v40 = vadd.f32 %v2281_v37, %v2280_v35 }
 0x4c2   : > { %v2290_v41 = vadd.f32 %v2424_v38, %v2282_v40 }
 0x4c4   : > { %2291 = vst.msk [vmem:[%s363_s11] sm:$0xff] %vm2275_vm4, %v2290_v41 }
 0x4c5   : > { %2752 = shalt.err (!%p2749_p3)
}
 0x4c6   : > { %s2753_s25 = scalar_lea.hbm %s3183_s26, 128  ;;  %s2757_s11 = scalar_lea.hbm %s3236_s10, 256 }
 0x4c7   : > { %p2754_p4 = scmp.ne.s32.totalorder %s3183_s26, %s2753_s25  ;;  %p2758_p9 = scmp.lt.u32.totalorder %s3183_s26, %s3236_s10 }
 0x4c8   : > { %p2759_p10 = scmp.lt.u32.totalorder %s2757_s11, %s2753_s25  ;;  %p2761_p12 = scmp.lt.u32.totalorder %s2753_s25, %s3183_s26 }
 0x4c9   : > { %p2755_p7 = pnand %p2754_p4, %p2900_p5 }
 0x4ca   : > { %p2760_p11 = por %p2759_p10, %p2758_p9 }
 0x4cb   : > { %p2756_p8 = pneg %p2755_p7 }
 0x4cc   : > { %p2762_p13 = por %p2761_p12, %p2760_p11 }
 0x4ce   : > { %p2763_p0 = pnand %p2762_p13, %p2756_p8 }
 0x4d0   : > { %2766 = shalt.err (!%p2763_p0)
}
 0x4d1   : > { %2681 = dma.vmem_to_hbm [thread:$0]  (%p2900_p5), %s3185_s12, 128, %s3183_s26, %s2293_s27  }
 0x4d2 PF: > { %p2687_p1 = scmp.ge.s32.totalorder %s2801_s16, 2  ;;  %s2318_s18 = sand.u32 1, %s2789_s13  }
 0x4d3   : > { %s2319_s17 = scalar_lea.sflag [#allocation3], %s2318_s18 }
 0x4d4   : > { %p2684_p2 = pnand %p2687_p1, %p2904_p6 }
 0x4d6   : > { %2784 = dma.done.wait (!%p2684_p2), %s2319_s17, 128  }
 0x4d7   : > { %2786 = vsyncadd (!%p2684_p2), %s2319_s17, 4294967168  ;;  %s3240_s28 = sld [smem:[#allocation5_spill]]  ;;  %p20_p3 = scmp.ge.s32.totalorder %s2887_s19, 4  }
 0x4d8   : > { %s3241_s13 = smov %s2793_s14  ;;  %s3242_s14 = smov %s2797_s15 }
 0x4d9   : > { %s3244_s16 = smov %s2887_s19  ;;  %22 = sbr.rel (!%p20_p3) target bundleno = 3 (0x3), region = 98 }
 0x4dd   : > { %s3243_s15 = smov %s3240_s28 }
 0x4e0   :  { %2324 = vsyncpa [#allocation3], 1 }
 0x4e1   :  { %2326 = vsyncpa [#allocation3 + $0x1], 1 }

</bundles_post_ra>
